<compile_context>
chip_gen: v7x
topology: tpu7x:2x2x1
jax: 0.10.0
libtpu: 0.0.40
codegen_flags: <defaults>
</compile_context>

<pallas_src>
import functools

import jax
import jax.numpy as jnp
from jax import lax
from jax.experimental import pallas as pl
from jax.experimental.pallas import tpu as pltpu

_LANES = 128
_SUBLANES = 8


# ---------------------------------------------------------------------------
# Packing helpers
# ---------------------------------------------------------------------------

def _full_spec(shape):
    nd = len(shape)
    return pl.BlockSpec(shape, lambda i, _nd=nd: (0,) * _nd)


def _pack_segments(segments):
    """Flatten (pred, target) pairs to 1D, pad each to a sublane-aligned number of
    128-lane rows and stack them row-wise into two lane-dense (R, 128) f32 slabs.

    Per-segment row ranges are static Python ints and 8-row aligned so the
    kernel's static slices never cross a sublane tile boundary.  Padding is zero
    in BOTH operands, so padded lanes/rows contribute exactly 0 to the SSE."""
    a_parts, b_parts, ranges = [], [], []
    row = 0
    for a, b in segments:
        a = jnp.asarray(a, jnp.float32).reshape(-1)
        b = jnp.asarray(b, jnp.float32).reshape(-1)
        n = a.shape[0]
        rows = (n + _LANES - 1) // _LANES
        rows = ((rows + _SUBLANES - 1) // _SUBLANES) * _SUBLANES
        pad = rows * _LANES - n
        a_parts.append(jnp.pad(a, (0, pad)).reshape(rows, _LANES))
        b_parts.append(jnp.pad(b, (0, pad)).reshape(rows, _LANES))
        ranges.append((row, row + rows))
        row += rows
    return (jnp.concatenate(a_parts, axis=0),
            jnp.concatenate(b_parts, axis=0),
            tuple(ranges))


# ---------------------------------------------------------------------------
# Pallas kernel (one launch computes every loss scalar)
# ---------------------------------------------------------------------------

def _fused_vibe_loss_kernel(seg_ranges, n_pred, n_dout,
                            a_ref, b_ref,        # packed (R,128) pred/target slabs
                            xm_ref,              # (N_all,128) mean-pooled disc feats
                            wd_ref, bd_ref,      # disc W (128,128), bias (1,128)
                            o_ref):              # (1,128) packed scalar outputs
    # ---- per-segment SSE over the lane-dense packed slabs ----
    # Weights / masks are pre-folded into a/b in the wrapper, so each segment is
    # just sum((a-b)^2).  Sums are taken directly on static ref slices (8-row
    # aligned) so no full-slab temporary is materialized in VMEM.
    sums = []
    for (ra, rb) in seg_ranges:
        d = a_ref[ra:rb, :] - b_ref[ra:rb, :]
        sums.append(jnp.sum(d * d))

    # ---- motion discriminator: linear (MXU) + its three L2 sums ----
    dv = jnp.dot(xm_ref[...], wd_ref[...],
                 preferred_element_type=jnp.float32) + bd_ref[...]
    lane = lax.broadcasted_iota(jnp.int32, dv.shape, 1)
    valid = lane < n_dout                       # W/b were zero-padded n_dout -> 128
    dm1sq = jnp.where(valid, (dv - 1.0) * (dv - 1.0), 0.0)
    dsq = dv * dv                               # padded lanes are exactly 0 already
    sums.append(jnp.sum(dm1sq[:n_pred, :]))     # disc(pred_motion) vs target 1
    sums.append(jnp.sum(dm1sq[n_pred:, :]))     # disc(real_motion) vs target 1
    sums.append(jnp.sum(dsq[:n_pred, :]))       # disc(fake_motion) vs target 0

    # ---- single lane-dense output: scalar k lives at lane k ----
    out_lane = lax.broadcasted_iota(jnp.int32, (1, _LANES), 1)
    out = jnp.zeros((1, _LANES), jnp.float32)
    for i, s in enumerate(sums):
        out = jnp.where(out_lane == i, s, out)
    o_ref[...] = out


# ---------------------------------------------------------------------------
# Plain-JAX glue (Rodrigues)
# ---------------------------------------------------------------------------

def quat2mat(quat):
    norm_quat = quat / jnp.linalg.norm(quat, axis=1, keepdims=True)
    w, x, y, z = norm_quat[:, 0], norm_quat[:, 1], norm_quat[:, 2], norm_quat[:, 3]
    B = quat.shape[0]
    w2, x2, y2, z2 = w * w, x * x, y * y, z * z
    wx, wy, wz = w * x, w * y, w * z
    xy, xz, yz = x * y, x * z, y * z
    rot = jnp.stack(
        [
            w2 + x2 - y2 - z2, 2 * xy - 2 * wz, 2 * wy + 2 * xz,
            2 * wz + 2 * xy, w2 - x2 + y2 - z2, 2 * yz - 2 * wx,
            2 * xz - 2 * wy, 2 * wx + 2 * yz, w2 - x2 - y2 + z2,
        ],
        axis=1,
    ).reshape(B, 3, 3)
    return rot


# TODO(synk): batch_rodrigues (axis-angle -> 3x3 rotmat) stays in plain JAX; the
# MSE over the resulting rotation matrices IS computed inside the Pallas kernel.
def batch_rodrigues(theta):
    l2norm = jnp.linalg.norm(theta + 1e-8, axis=1, keepdims=True)
    normalized = theta / l2norm
    half = l2norm * 0.5
    v_cos = jnp.cos(half)
    v_sin = jnp.sin(half)
    quat = jnp.concatenate([v_cos, v_sin * normalized], axis=1)
    return quat2mat(quat)


# ---------------------------------------------------------------------------
# VIBELoss forward (single fused Pallas launch, fully jitted)
# ---------------------------------------------------------------------------

class VIBELossPallas:
    def __init__(self, e_loss_weight=60.0, e_3d_loss_weight=30.0,
                 e_pose_loss_weight=1.0, e_shape_loss_weight=0.001,
                 d_motion_loss_weight=1.0):
        self.e_loss_weight = e_loss_weight
        self.e_3d_loss_weight = e_3d_loss_weight
        self.e_pose_loss_weight = e_pose_loss_weight
        self.e_shape_loss_weight = e_shape_loss_weight
        self.d_motion_loss_weight = d_motion_loss_weight
        self._forward = jax.jit(self._forward_impl)

    def __call__(self, generator_outputs, data_2d, data_3d,
                 data_motion_mosh, disc_W, disc_b):
        return self._forward(generator_outputs, data_2d, data_3d,
                             data_motion_mosh, disc_W, disc_b)

    def _forward_impl(self, generator_outputs, data_2d, data_3d,
                      data_motion_mosh, disc_W, disc_b):
        reduce_ = lambda x: x.reshape((x.shape[0] * x.shape[1],) + x.shape[2:])

        if data_2d:
            sample_2d_count = data_2d['kp_2d'].shape[0]
            real_2d = jnp.concatenate([data_2d['kp_2d'], data_3d['kp_2d']], axis=0)
        else:
            sample_2d_count = 0
            real_2d = data_3d['kp_2d']

        real_2d = reduce_(real_2d).astype(jnp.float32)               # (M2, J, 3)
        real_3d = reduce_(data_3d['kp_3d']).astype(jnp.float32)      # (M3, J, 3)
        data_3d_theta = reduce_(data_3d['theta']).astype(jnp.float32)
        # TODO(synk): the reference's dynamic boolean-mask row gather is replaced
        # by static-shape 0/1 row weights so the whole forward stays jittable.
        w_3d = (data_3d['w_3d'].reshape(-1) != 0).astype(jnp.float32)
        w_smpl = (data_3d['w_smpl'].reshape(-1) != 0).astype(jnp.float32)

        total_predict_thetas = jnp.concatenate(
            [o['theta'] for o in generator_outputs], axis=0)
        preds = generator_outputs[-1]
        pred_j3d = reduce_(preds['kp_3d'][sample_2d_count:]).astype(jnp.float32)
        pred_theta = reduce_(preds['theta'][sample_2d_count:]).astype(jnp.float32)
        pred_j2d = reduce_(preds['kp_2d']).astype(jnp.float32)

        # -- 2D keypoint segment: fold sqrt(conf) into BOTH operands --
        # conf*(a-b)^2 == (sqrt(conf)*a - sqrt(conf)*b)^2, exact for conf >= 0
        # (keypoint confidences are non-negative; the clamp guards bad data).
        openpose_weight, gt_weight = 1.0, 1.0
        J = real_2d.shape[1]
        jscale = jnp.where(jnp.arange(J) < 25, openpose_weight, gt_weight)
        conf = real_2d[:, :, 2:3] * jscale[None, :, None]
        sqrt_w = jnp.sqrt(jnp.maximum(conf, 0.0))
        a_kp2d = sqrt_w * pred_j2d
        b_kp2d = sqrt_w * real_2d[:, :, :2]

        # -- 3D keypoint segment: pelvis-center + fold 0/1 row mask in wrapper --
        pred_j3d14 = pred_j3d[:, 25:39, :]
        gt_j3d14 = real_3d[:, 25:39, :]
        pred_pel = (pred_j3d14[:, 2, :] + pred_j3d14[:, 3, :]) * 0.5
        gt_pel = (gt_j3d14[:, 2, :] + gt_j3d14[:, 3, :]) * 0.5
        m3 = w_3d[:, None, None]
        a_kp3d = (pred_j3d14 - pred_pel[:, None, :]) * m3
        b_kp3d = (gt_j3d14 - gt_pel[:, None, :]) * m3

        # -- SMPL pose / shape segments (0/1 mask folded into both operands) --
        real_shape, pred_shape = data_3d_theta[:, 75:], pred_theta[:, 75:]
        real_pose, pred_pose = data_3d_theta[:, 3:75], pred_theta[:, 3:75]
        pred_rm = batch_rodrigues(pred_pose.reshape(-1, 3)).reshape(pred_pose.shape[0], -1)
        gt_rm = batch_rodrigues(real_pose.reshape(-1, 3)).reshape(real_pose.shape[0], -1)
        ws = w_smpl[:, None]
        a_pose, b_pose = pred_rm * ws, gt_rm * ws
        a_beta, b_beta = pred_shape * ws, real_shape * ws

        pk_a, pk_b, seg_ranges = _pack_segments([
            (a_kp2d, b_kp2d),      # lane 0: kp2d SSE
            (a_kp3d, b_kp3d),      # lane 1: kp3d SSE
            (a_pose, b_pose),      # lane 2: pose-rotmat SSE
            (a_beta, b_beta),      # lane 3: betas SSE
        ])

        # -- motion-discriminator inputs --
        # TODO(synk): the external motion_discriminator module is modelled as a
        # temporal mean-pool + linear (69 -> 25); forward-only fusion: disc(pred)
        # and disc(stop_gradient(pred)) share forward values, so the GEMM runs
        # once for the pred rows.
        start_idx, end_idx = 6, 75
        pred_feat = total_predict_thetas[:, :, start_idx:end_idx].astype(jnp.float32)
        real_feat = data_motion_mosh['theta'][:, :, start_idx:end_idx].astype(jnp.float32)
        n_pred, n_real = pred_feat.shape[0], real_feat.shape[0]
        # temporal mean-pool done in the wrapper: cuts the disc-input DMA by T x
        xm = jnp.concatenate([jnp.mean(pred_feat, axis=1),
                              jnp.mean(real_feat, axis=1)], axis=0)   # (N_all, 69)
        F = xm.shape[-1]
        Fp = ((F + _LANES - 1) // _LANES) * _LANES
        D = disc_W.shape[1]
        Dp = ((D + _LANES - 1) // _LANES) * _LANES
        xm = jnp.pad(xm, ((0, 0), (0, Fp - F)))                       # (N_all, 128)
        # NOTE: padded W columns / bias lanes must stay exactly zero so padded
        # disc lanes evaluate to 0 and drop out of the fake-motion L2 sum.
        w_disc = jnp.pad(jnp.asarray(disc_W, jnp.float32), ((0, Fp - F), (0, Dp - D)))
        b_disc = jnp.pad(jnp.asarray(disc_b, jnp.float32).reshape(1, -1),
                         ((0, 0), (0, Dp - D)))

        kernel = functools.partial(_fused_vibe_loss_kernel, seg_ranges, n_pred, D)
        # TODO(synk): at production batch sizes add a "parallel" row-tiled grid
        # axis over the packed slab (v7x: 2 TCs / 64 MiB VMEM) instead of grid=(1,).
        out = pl.pallas_call(
            kernel,
            out_shape=jax.ShapeDtypeStruct((1, _LANES), jnp.float32),
            grid=(1,),
            in_specs=[_full_spec(pk_a.shape), _full_spec(pk_b.shape),
                      _full_spec(xm.shape), _full_spec(w_disc.shape),
                      _full_spec(b_disc.shape)],
            out_specs=_full_spec((1, _LANES)),
            compiler_params=pltpu.CompilerParams(
                dimension_semantics=("arbitrary",),
                vmem_limit_bytes=32 * 1024 * 1024),
        )(pk_a, pk_b, xm, w_disc, b_disc)

        vals = out.reshape(-1)
        sse_kp2d, sse_kp3d, sse_pose, sse_beta = vals[0], vals[1], vals[2], vals[3]
        sse_enc, sse_real, sse_fake = vals[4], vals[5], vals[6]

        cnt_3d = jnp.maximum(jnp.sum(w_3d), 1.0)
        cnt_smpl = jnp.maximum(jnp.sum(w_smpl), 1.0)

        loss_kp_2d = sse_kp2d / pred_j2d.size * self.e_loss_weight
        loss_kp_3d = (sse_kp3d
                      / (cnt_3d * pred_j3d14.shape[1] * pred_j3d14.shape[2])
                      * self.e_3d_loss_weight)

        loss_dict = {'loss_kp_2d': loss_kp_2d, 'loss_kp_3d': loss_kp_3d}
        if pred_theta.shape[0] > 0:
            loss_pose = sse_pose / (cnt_smpl * pred_rm.shape[1]) * self.e_pose_loss_weight
            loss_shape = sse_beta / (cnt_smpl * pred_shape.shape[1]) * self.e_shape_loss_weight
            loss_dict['loss_shape'] = loss_shape
            loss_dict['loss_pose'] = loss_pose

        gen_loss = jnp.stack(list(loss_dict.values())).sum()

        e_m_disc_loss = sse_enc / n_pred * self.d_motion_loss_weight
        d_real = sse_real / n_real * self.d_motion_loss_weight
        d_fake = sse_fake / n_pred * self.d_motion_loss_weight
        d_loss = d_real + d_fake

        loss_dict['e_m_disc_loss'] = e_m_disc_loss
        loss_dict['d_m_disc_real'] = d_real
        loss_dict['d_m_disc_fake'] = d_fake
        loss_dict['d_m_disc_loss'] = d_loss

        gen_loss = gen_loss + e_m_disc_loss
        motion_dis_loss = d_loss
        return gen_loss, motion_dis_loss, loss_dict


# ---------------------------------------------------------------------------
# Example run
# ---------------------------------------------------------------------------

if __name__ == "__main__":
    key = jax.random.PRNGKey(0)
    keys = jax.random.split(key, 12)

    B2, B3, T, J = 2, 2, 4, 49          # 2D batch, 3D batch, seq len, joints
    NTHETA = 85                          # cam(3) + pose(72) + shape(10)
    BM = 3                               # mosh (real motion) batch

    def make_kp2d(k, b):
        # coords ~ N(0,1), confidence channel in [0,1] (non-negative, as in VIBE)
        coords = jax.random.normal(k, (b, T, J, 2), jnp.float32)
        conf = jax.random.uniform(jax.random.fold_in(k, 1), (b, T, J, 1),
                                  jnp.float32)
        return jnp.concatenate([coords, conf], axis=-1)

    data_2d = {
        'kp_2d': make_kp2d(keys[0], B2),
    }
    data_3d = {
        'kp_2d': make_kp2d(keys[1], B3),
        'kp_3d': jax.random.normal(keys[2], (B3, T, J, 3), jnp.float32),
        'theta': jax.random.normal(keys[3], (B3, T, NTHETA), jnp.float32),
        'w_3d': jnp.ones((B3, T), jnp.float32),
        'w_smpl': jnp.ones((B3, T), jnp.float32),
    }
    Btot = B2 + B3
    generator_outputs = [
        {
            'theta': jax.random.normal(keys[4 + 3 * i], (Btot, T, NTHETA), jnp.float32),
            'kp_2d': jax.random.normal(keys[5 + 3 * i], (Btot, T, J, 2), jnp.float32),
            'kp_3d': jax.random.normal(keys[6 + 3 * i], (Btot, T, J, 3), jnp.float32),
        }
        for i in range(2)
    ]
    data_motion_mosh = {
        'theta': jax.random.normal(keys[10], (BM, T, NTHETA), jnp.float32),
    }

    # deterministic synthetic motion-discriminator parameters: 69 -> 25
    disc_W = 0.01 * jax.random.normal(jax.random.PRNGKey(42), (69, 25), jnp.float32)
    disc_b = jnp.zeros((1, 25), jnp.float32)

    loss_fn = VIBELossPallas()
    gen_loss, motion_dis_loss, loss_dict = loss_fn(
        generator_outputs, data_2d, data_3d, data_motion_mosh, disc_W, disc_b)

    jax.block_until_ready(gen_loss)
    jax.block_until_ready(motion_dis_loss)
    for v in loss_dict.values():
        jax.block_until_ready(v)

    print("KERNEL_OK")
</pallas_src>

<mosaic_0001>
module attributes {stable_mosaic.version = 11 : i64} {
  func.func @_fused_vibe_loss_kernel(%arg0: i32, %arg1: memref<48x128xf32, #tpu.memory_space<vmem>>, %arg2: memref<48x128xf32, #tpu.memory_space<vmem>>, %arg3: memref<11x128xf32, #tpu.memory_space<vmem>>, %arg4: memref<128x128xf32, #tpu.memory_space<vmem>>, %arg5: memref<1x128xf32, #tpu.memory_space<vmem>>, %arg6: memref<1x128xf32, #tpu.memory_space<vmem>>) attributes {dimension_semantics = [#tpu.dimension_semantics<arbitrary>], iteration_bounds = array<i64: 1>, scalar_prefetch = 0 : i64, scratch_operands = 0 : i64, tpu.core_type = #tpu.core_type<tc>, window_params = [{pipeline_mode = #tpu.pipeline_mode<synchronous>, transform_indices = @transform_0, window_bounds = array<i64: 48, 128>}, {pipeline_mode = #tpu.pipeline_mode<synchronous>, transform_indices = @transform_1, window_bounds = array<i64: 48, 128>}, {pipeline_mode = #tpu.pipeline_mode<synchronous>, transform_indices = @transform_2, window_bounds = array<i64: 11, 128>}, {pipeline_mode = #tpu.pipeline_mode<synchronous>, transform_indices = @transform_3, window_bounds = array<i64: 128, 128>}, {pipeline_mode = #tpu.pipeline_mode<synchronous>, transform_indices = @transform_4, window_bounds = array<i64: 1, 128>}, {pipeline_mode = #tpu.pipeline_mode<synchronous>, transform_indices = @transform_5, window_bounds = array<i64: 1, 128>}]} {
    %c0 = arith.constant 0 : index
    %c0_0 = arith.constant 0 : index
    %0 = vector.load %arg1[%c0, %c0_0] : memref<48x128xf32, #tpu.memory_space<vmem>>, vector<16x128xf32>
    %c0_1 = arith.constant 0 : index
    %c0_2 = arith.constant 0 : index
    %1 = vector.load %arg2[%c0_1, %c0_2] : memref<48x128xf32, #tpu.memory_space<vmem>>, vector<16x128xf32>
    %2 = arith.subf %0, %1 : vector<16x128xf32>
    %3 = arith.mulf %2, %2 : vector<16x128xf32>
    %4 = vector.shape_cast %3 : vector<16x128xf32> to vector<1x16x128xf32>
    %cst = arith.constant dense<0.000000e+00> : vector<1xf32>
    %5 = vector.multi_reduction <add>, %4, %cst [1, 2] : vector<1x16x128xf32> to vector<1xf32>
    %6 = vector.shape_cast %5 : vector<1xf32> to vector<1x1x1xf32>
    %7 = vector.extract %6[0, 0, 0] : f32 from vector<1x1x1xf32>
    %c16 = arith.constant 16 : index
    %c0_3 = arith.constant 0 : index
    %8 = vector.load %arg1[%c16, %c0_3] : memref<48x128xf32, #tpu.memory_space<vmem>>, vector<8x128xf32>
    %c16_4 = arith.constant 16 : index
    %c0_5 = arith.constant 0 : index
    %9 = vector.load %arg2[%c16_4, %c0_5] : memref<48x128xf32, #tpu.memory_space<vmem>>, vector<8x128xf32>
    %10 = arith.subf %8, %9 : vector<8x128xf32>
    %11 = arith.mulf %10, %10 : vector<8x128xf32>
    %12 = vector.shape_cast %11 : vector<8x128xf32> to vector<1x8x128xf32>
    %cst_6 = arith.constant dense<0.000000e+00> : vector<1xf32>
    %13 = vector.multi_reduction <add>, %12, %cst_6 [1, 2] : vector<1x8x128xf32> to vector<1xf32>
    %14 = vector.shape_cast %13 : vector<1xf32> to vector<1x1x1xf32>
    %15 = vector.extract %14[0, 0, 0] : f32 from vector<1x1x1xf32>
    %c24 = arith.constant 24 : index
    %c0_7 = arith.constant 0 : index
    %16 = vector.load %arg1[%c24, %c0_7] : memref<48x128xf32, #tpu.memory_space<vmem>>, vector<16x128xf32>
    %c24_8 = arith.constant 24 : index
    %c0_9 = arith.constant 0 : index
    %17 = vector.load %arg2[%c24_8, %c0_9] : memref<48x128xf32, #tpu.memory_space<vmem>>, vector<16x128xf32>
    %18 = arith.subf %16, %17 : vector<16x128xf32>
    %19 = arith.mulf %18, %18 : vector<16x128xf32>
    %20 = vector.shape_cast %19 : vector<16x128xf32> to vector<1x16x128xf32>
    %cst_10 = arith.constant dense<0.000000e+00> : vector<1xf32>
    %21 = vector.multi_reduction <add>, %20, %cst_10 [1, 2] : vector<1x16x128xf32> to vector<1xf32>
    %22 = vector.shape_cast %21 : vector<1xf32> to vector<1x1x1xf32>
    %23 = vector.extract %22[0, 0, 0] : f32 from vector<1x1x1xf32>
    %c40 = arith.constant 40 : index
    %c0_11 = arith.constant 0 : index
    %24 = vector.load %arg1[%c40, %c0_11] : memref<48x128xf32, #tpu.memory_space<vmem>>, vector<8x128xf32>
    %c40_12 = arith.constant 40 : index
    %c0_13 = arith.constant 0 : index
    %25 = vector.load %arg2[%c40_12, %c0_13] : memref<48x128xf32, #tpu.memory_space<vmem>>, vector<8x128xf32>
    %26 = arith.subf %24, %25 : vector<8x128xf32>
    %27 = arith.mulf %26, %26 : vector<8x128xf32>
    %28 = vector.shape_cast %27 : vector<8x128xf32> to vector<1x8x128xf32>
    %cst_14 = arith.constant dense<0.000000e+00> : vector<1xf32>
    %29 = vector.multi_reduction <add>, %28, %cst_14 [1, 2] : vector<1x8x128xf32> to vector<1xf32>
    %30 = vector.shape_cast %29 : vector<1xf32> to vector<1x1x1xf32>
    %31 = vector.extract %30[0, 0, 0] : f32 from vector<1x1x1xf32>
    %c0_15 = arith.constant 0 : index
    %c0_16 = arith.constant 0 : index
    %32 = vector.load %arg3[%c0_15, %c0_16] : memref<11x128xf32, #tpu.memory_space<vmem>>, vector<11x128xf32>
    %c0_17 = arith.constant 0 : index
    %c0_18 = arith.constant 0 : index
    %33 = vector.load %arg4[%c0_17, %c0_18] : memref<128x128xf32, #tpu.memory_space<vmem>>, vector<128x128xf32>
    %cst_19 = arith.constant dense<0.000000e+00> : vector<11x128xf32>
    %34 = tpu.matmul %32, %33, %cst_19 {dimension_numbers = #tpu.dot_dimension_numbers<[1], [0], [0], [1], [0, 0, 1, 1], [], []>} : vector<11x128xf32>, vector<128x128xf32>, vector<11x128xf32> -> vector<11x128xf32>
    %c0_20 = arith.constant 0 : index
    %c0_21 = arith.constant 0 : index
    %35 = vector.load %arg5[%c0_20, %c0_21] : memref<1x128xf32, #tpu.memory_space<vmem>>, vector<1x128xf32>
    %36 = vector.broadcast %35 : vector<1x128xf32> to vector<11x128xf32>
    %37 = arith.addf %34, %36 : vector<11x128xf32>
    %38 = tpu.iota {dimensions = array<i32: 1>} : vector<11x128xi32>
    %c25_i32 = arith.constant 25 : i32
    %39 = vector.broadcast %c25_i32 : i32 to vector<11x128xi32>
    %40 = arith.cmpi slt, %38, %39 : vector<11x128xi32>
    %cst_22 = arith.constant 1.000000e+00 : f32
    %41 = vector.broadcast %cst_22 : f32 to vector<11x128xf32>
    %42 = arith.subf %37, %41 : vector<11x128xf32>
    %cst_23 = arith.constant 1.000000e+00 : f32
    %43 = vector.broadcast %cst_23 : f32 to vector<11x128xf32>
    %44 = arith.subf %37, %43 : vector<11x128xf32>
    %45 = arith.mulf %42, %44 : vector<11x128xf32>
    %cst_24 = arith.constant 0.000000e+00 : f32
    %46 = vector.broadcast %cst_24 : f32 to vector<11x128xf32>
    %47 = arith.select %40, %45, %46 : vector<11x128xi1>, vector<11x128xf32>
    %48 = arith.mulf %37, %37 : vector<11x128xf32>
    %49 = vector.extract_strided_slice %47 {offsets = [0, 0], sizes = [8, 128], strides = [1, 1]} : vector<11x128xf32> to vector<8x128xf32>
    %50 = vector.shape_cast %49 : vector<8x128xf32> to vector<1x8x128xf32>
    %cst_25 = arith.constant dense<0.000000e+00> : vector<1xf32>
    %51 = vector.multi_reduction <add>, %50, %cst_25 [1, 2] : vector<1x8x128xf32> to vector<1xf32>
    %52 = vector.shape_cast %51 : vector<1xf32> to vector<1x1x1xf32>
    %53 = vector.extract %52[0, 0, 0] : f32 from vector<1x1x1xf32>
    %54 = vector.extract_strided_slice %47 {offsets = [8, 0], sizes = [3, 128], strides = [1, 1]} : vector<11x128xf32> to vector<3x128xf32>
    %55 = vector.shape_cast %54 : vector<3x128xf32> to vector<1x3x128xf32>
    %cst_26 = arith.constant dense<0.000000e+00> : vector<1xf32>
    %56 = vector.multi_reduction <add>, %55, %cst_26 [1, 2] : vector<1x3x128xf32> to vector<1xf32>
    %57 = vector.shape_cast %56 : vector<1xf32> to vector<1x1x1xf32>
    %58 = vector.extract %57[0, 0, 0] : f32 from vector<1x1x1xf32>
    %59 = vector.extract_strided_slice %48 {offsets = [0, 0], sizes = [8, 128], strides = [1, 1]} : vector<11x128xf32> to vector<8x128xf32>
    %60 = vector.shape_cast %59 : vector<8x128xf32> to vector<1x8x128xf32>
    %cst_27 = arith.constant dense<0.000000e+00> : vector<1xf32>
    %61 = vector.multi_reduction <add>, %60, %cst_27 [1, 2] : vector<1x8x128xf32> to vector<1xf32>
    %62 = vector.shape_cast %61 : vector<1xf32> to vector<1x1x1xf32>
    %63 = vector.extract %62[0, 0, 0] : f32 from vector<1x1x1xf32>
    %64 = tpu.iota {dimensions = array<i32: 1>} : vector<1x128xi32>
    %cst_28 = arith.constant 0.000000e+00 : f32
    %65 = vector.broadcast %cst_28 : f32 to vector<1x128xf32>
    %c0_i32 = arith.constant 0 : i32
    %66 = vector.broadcast %c0_i32 : i32 to vector<1x128xi32>
    %67 = arith.cmpi eq, %64, %66 : vector<1x128xi32>
    %68 = vector.broadcast %7 : f32 to vector<1x128xf32>
    %69 = arith.select %67, %68, %65 : vector<1x128xi1>, vector<1x128xf32>
    %c1_i32 = arith.constant 1 : i32
    %70 = vector.broadcast %c1_i32 : i32 to vector<1x128xi32>
    %71 = arith.cmpi eq, %64, %70 : vector<1x128xi32>
    %72 = vector.broadcast %15 : f32 to vector<1x128xf32>
    %73 = arith.select %71, %72, %69 : vector<1x128xi1>, vector<1x128xf32>
    %c2_i32 = arith.constant 2 : i32
    %74 = vector.broadcast %c2_i32 : i32 to vector<1x128xi32>
    %75 = arith.cmpi eq, %64, %74 : vector<1x128xi32>
    %76 = vector.broadcast %23 : f32 to vector<1x128xf32>
    %77 = arith.select %75, %76, %73 : vector<1x128xi1>, vector<1x128xf32>
    %c3_i32 = arith.constant 3 : i32
    %78 = vector.broadcast %c3_i32 : i32 to vector<1x128xi32>
    %79 = arith.cmpi eq, %64, %78 : vector<1x128xi32>
    %80 = vector.broadcast %31 : f32 to vector<1x128xf32>
    %81 = arith.select %79, %80, %77 : vector<1x128xi1>, vector<1x128xf32>
    %c4_i32 = arith.constant 4 : i32
    %82 = vector.broadcast %c4_i32 : i32 to vector<1x128xi32>
    %83 = arith.cmpi eq, %64, %82 : vector<1x128xi32>
    %84 = vector.broadcast %53 : f32 to vector<1x128xf32>
    %85 = arith.select %83, %84, %81 : vector<1x128xi1>, vector<1x128xf32>
    %c5_i32 = arith.constant 5 : i32
    %86 = vector.broadcast %c5_i32 : i32 to vector<1x128xi32>
    %87 = arith.cmpi eq, %64, %86 : vector<1x128xi32>
    %88 = vector.broadcast %58 : f32 to vector<1x128xf32>
    %89 = arith.select %87, %88, %85 : vector<1x128xi1>, vector<1x128xf32>
    %c6_i32 = arith.constant 6 : i32
    %90 = vector.broadcast %c6_i32 : i32 to vector<1x128xi32>
    %91 = arith.cmpi eq, %64, %90 : vector<1x128xi32>
    %92 = vector.broadcast %63 : f32 to vector<1x128xf32>
    %93 = arith.select %91, %92, %89 : vector<1x128xi1>, vector<1x128xf32>
    %c0_29 = arith.constant 0 : index
    %c0_30 = arith.constant 0 : index
    %94 = vector.load %arg6[%c0_29, %c0_30] : memref<1x128xf32, #tpu.memory_space<vmem>>, vector<1x128xf32>
    tpu.vector_store %arg6[%c0_29, %c0_30], %93 {strides = array<i32>} : memref<1x128xf32, #tpu.memory_space<vmem>>, vector<1x128xf32>,
    return
  }
  func.func @transform_0(%arg0: i32) -> (i32, i32) {
    %c0_i32 = arith.constant 0 : i32
    %c0_i32_0 = arith.constant 0 : i32
    %c0_i32_1 = arith.constant 0 : i32
    return %c0_i32, %c0_i32_0 : i32, i32
  }
  func.func @transform_1(%arg0: i32) -> (i32, i32) {
    %c0_i32 = arith.constant 0 : i32
    %c0_i32_0 = arith.constant 0 : i32
    %c0_i32_1 = arith.constant 0 : i32
    return %c0_i32, %c0_i32_0 : i32, i32
  }
  func.func @transform_2(%arg0: i32) -> (i32, i32) {
    %c0_i32 = arith.constant 0 : i32
    %c0_i32_0 = arith.constant 0 : i32
    %c0_i32_1 = arith.constant 0 : i32
    return %c0_i32, %c0_i32_0 : i32, i32
  }
  func.func @transform_3(%arg0: i32) -> (i32, i32) {
    %c0_i32 = arith.constant 0 : i32
    %c0_i32_0 = arith.constant 0 : i32
    %c0_i32_1 = arith.constant 0 : i32
    return %c0_i32, %c0_i32_0 : i32, i32
  }
  func.func @transform_4(%arg0: i32) -> (i32, i32) {
    %c0_i32 = arith.constant 0 : i32
    %c0_i32_0 = arith.constant 0 : i32
    %c0_i32_1 = arith.constant 0 : i32
    return %c0_i32, %c0_i32_0 : i32, i32
  }
  func.func @transform_5(%arg0: i32) -> (i32, i32) {
    %c0_i32 = arith.constant 0 : i32
    %c0_i32_0 = arith.constant 0 : i32
    %c0_i32_1 = arith.constant 0 : i32
    return %c0_i32, %c0_i32_0 : i32, i32
  }
}

</mosaic_0001>

<bundles_post_ra>
// kernel: mul.6
= control target key start
LH: loop header
LB: loop body
LE: loop exit
PB: predicated region body
PF: predicated region fallthrough
CT: control target
= control target key end

     0   :  { %s56_s0 = inlined_call_operand.vmem [shape: f32[1568], index: 0, kind: input, shape index: {}]   ;;  %s57_s1 = inlined_call_operand.vmem [shape: f32[1568], index: 1, kind: input, shape index: {}]   ;;  %s58_s2 = inlined_call_operand.vmem [shape: f32[1568], index: 2, kind: output, shape index: {}]  }
   0x1   :  { %v3_v0 = vld [vmem:[%s56_s0] sm:$0xff]  ;;  %v20_v2 = vld [vmem:[%s56_s0 + $0x8] sm:$0xff] }
   0x2   :  { %v4_v1 = vld [vmem:[%s57_s1] sm:$0xff]  ;;  %v21_v4 = vld [vmem:[%s57_s1 + $0x8] sm:$0xff] }
   0x3   :  { %v7_v3 = vmul.f32 %v4_v1, %v3_v0  ;;  %v16_v5 = vmul.f32 %v21_v4, %v20_v2 }
   0x5   :  { %9 = vst [vmem:[%s58_s2] sm:$0xff] %v7_v3  ;;  %22 = vst [vmem:[%s58_s2 + $0x8] sm:$0xff] %v16_v5 }

// kernel: _forward_impl.1
= control target key start
LH: loop header
LB: loop body
LE: loop exit
PB: predicated region body
PF: predicated region fallthrough
CT: control target
= control target key end

     0   :  { %vm201_vm1 = vcmask 1042432   ;;  %s485_s3 = inlined_call_operand.vmem [shape: f32[128,128], index: 3, kind: input, shape index: {}]   ;;  %s486_s2 = inlined_call_operand.vmem [shape: f32[11,128], index: 2, kind: input, shape index: {}]   ;;  %s487_s0 = inlined_call_operand.vmem [shape: f32[48,128], index: 0, kind: input, shape index: {}]   ;;  %s488_s1 = inlined_call_operand.vmem [shape: f32[48,128], index: 1, kind: input, shape index: {}]   ;;  %s489_s4 = inlined_call_operand.vmem [shape: f32[1,128], index: 4, kind: input, shape index: {}]   ;;  %s490_s5 = inlined_call_operand.vmem [shape: f32[1,128], index: 5, kind: output, shape index: {}]  }
   0x1   :  { %v84_v0 = vld [vmem:[%s485_s3] sm:$0xff]  ;;  %v85_v1 = vld [vmem:[%s485_s3 + $0x8] sm:$0xff]  ;;  %v86_v2 = vld [vmem:[%s485_s3 + $0x10] sm:$0xff] }
   0x2   :  { %v303_v3 = vpack.c.bf16 %v85_v1, %v84_v0  ;;  %v87_v4 = vld [vmem:[%s485_s3 + $0x18] sm:$0xff]  ;;  %v88_v6 = vld [vmem:[%s485_s3 + $0x20] sm:$0xff]  ;;  %v89_v7 = vld [vmem:[%s485_s3 + $0x28] sm:$0xff] }
   0x3   :  { %v307_v5 = vpack.c.bf16 %v87_v4, %v86_v2  ;;  %v311_v8 = vpack.c.bf16 %v89_v7, %v88_v6  ;;  %v90_v9 = vld [vmem:[%s485_s3 + $0x30] sm:$0xff]  ;;  %v91_v10 = vld [vmem:[%s485_s3 + $0x38] sm:$0xff]  ;;  %v82_v11 = vld [vmem:[%s486_s2] sm:$0xff] }
   0x4   :  { %304 = vmatprep.subr.bf16.mxu0 %v303_v3  ;;  %300 = vmatprep.mubr.f32.mxu0 %v82_v11  ;;  %v38_v12 = vld [vmem:[%s487_s0 + $0x10] sm:$0xff]  ;;  %v69_v14 = vld [vmem:[%s487_s0 + $0x28] sm:$0xff]  ;;  %v20_v17 = vld [vmem:[%s487_s0] sm:$0xff]  ;;  %v315_v23 = vpack.c.bf16 %v91_v10, %v90_v9 }
   0x5   :  { %306 = vmatpush3.bf16.msra.mxu0 %v303_v3  ;;  %v39_v13 = vld [vmem:[%s488_s1 + $0x10] sm:$0xff]  ;;  %v70_v16 = vld [vmem:[%s488_s1 + $0x28] sm:$0xff]  ;;  %v22_v20 = vld [vmem:[%s488_s1] sm:$0xff]  ;;  %v182_v3 = vlaneseq }
   0x6   :  { %308 = vmatprep.subr.bf16.mxu0 %v307_v5  ;;  %v40_v15 = vsub.f32 %v38_v12, %v39_v13  ;;  %v21_v18 = vld [vmem:[%s487_s0 + $0x8] sm:$0xff]  ;;  %v71_v19 = vsub.f32 %v69_v14, %v70_v16  ;;  %v51_v22 = vld [vmem:[%s487_s0 + $0x18] sm:$0xff]  ;;  %v24_v25 = vsub.f32 %v20_v17, %v22_v20  ;;  %v52_v27 = vld [vmem:[%s487_s0 + $0x20] sm:$0xff] }
   0x7   :  { %v23_v21 = vld [vmem:[%s488_s1 + $0x8] sm:$0xff]  ;;  %v53_v28 = vld [vmem:[%s488_s1 + $0x18] sm:$0xff]  ;;  %v54_v29 = vld [vmem:[%s488_s1 + $0x20] sm:$0xff]  ;;  %v472_v6 = vand.u32 127, %v182_v3 }
   0x8   :  { %v41_v24 = vmul.f32 %v40_v15, %v40_v15  ;;  %v25_v26 = vsub.f32 %v21_v18, %v23_v21  ;;  %v92_v30 = vld [vmem:[%s485_s3 + $0x40] sm:$0xff]  ;;  %v93_v31 = vld [vmem:[%s485_s3 + $0x48] sm:$0xff]  ;;  %v72_v32 = vmul.f32 %v71_v19, %v71_v19  ;;  %v55_v33 = vsub.f32 %v51_v22, %v53_v28  ;;  %v94_v41 = vld [vmem:[%s485_s3 + $0x50] sm:$0xff] }
   0x9   :  { %310 = vmatpush3.bf16.msra.mxu0 %v307_v5  ;;  %v56_v34 = vsub.f32 %v52_v27, %v54_v29  ;;  %v26_v35 = vmul.f32 %v24_v25, %v24_v25  ;;  %v319_v39 = vpack.c.bf16 %v93_v31, %v92_v30  ;;  %v95_v42 = vld [vmem:[%s485_s3 + $0x58] sm:$0xff]  ;;  %v96_v45 = vld [vmem:[%s485_s3 + $0x60] sm:$0xff]  ;;  %v97_v46 = vld [vmem:[%s485_s3 + $0x68] sm:$0xff]  ;;  %vm184_vm0 = vcmp.lt.s32.totalorder %v472_v6, 25 }
   0xa   :  { %312 = vmatprep.subr.bf16.mxu0 %v311_v8  ;;  %42 = vadd.xlane.f32.xlu0 %v41_v24  ;;  %v27_v36 = vmul.f32 %v25_v26, %v25_v26  ;;  %v57_v37 = vmul.f32 %v55_v33, %v55_v33  ;;  %v323_v44 = vpack.c.bf16 %v95_v42, %v94_v41  ;;  %v98_v48 = vld [vmem:[%s485_s3 + $0x70] sm:$0xff]  ;;  %v99_v49 = vld [vmem:[%s485_s3 + $0x78] sm:$0xff]  ;;  %v83_v51 = vld [vmem:[%s486_s2 + $0x8] sm:$0x7]  ;;  %vm221_vm2 = vcmp.eq.s32.totalorder %v472_v6, 0 }
   0xb   :  { %73 = vadd.xlane.f32.xlu1 %v72_v32  ;;  %v58_v38 = vmul.f32 %v56_v34, %v56_v34  ;;  %v327_v47 = vpack.c.bf16 %v97_v46, %v96_v45  ;;  %v331_v50 = vpack.c.bf16 %v99_v49, %v98_v48  ;;  %v247_v4 = vld [vmem:[%s489_s4] ss:$0 sm:$0xff]  ;;  %vm224_vm3 = vcmp.eq.s32.totalorder %v472_v6, 1 }
   0xc   :  { %v28_v40 = vadd.f32 %v27_v36, %v26_v35  ;;  %vm227_vm4 = vcmp.eq.s32.totalorder %v472_v6, 2  ;;  %vm230_vm5 = vcmp.eq.s32.totalorder %v472_v6, 3  ;;  %vm233_vm6 = vcmp.eq.s32.totalorder %v472_v6, 4 }
   0xd   :  { %314 = vmatpush3.bf16.msra.mxu0 %v311_v8  ;;  %v59_v43 = vadd.f32 %v58_v38, %v57_v37  ;;  %vm236_vm7 = vcmp.eq.s32.totalorder %v472_v6, 5  ;;  %vm239_vm8 = vcmp.eq.s32.totalorder %v472_v6, 6 }
   0xe   :  { %316 = vmatprep.subr.bf16.mxu0 %v315_v23  ;;  %29 = vadd.xlane.f32.xlu0 %v28_v40 }
   0xf   :  { %60 = vadd.xlane.f32.xlu1 %v59_v43 }
  0x11   :  { %318 = vmatpush3.bf16.msra.mxu0 %v315_v23 }
  0x12   :  { %320 = vmatprep.subr.bf16.mxu0 %v319_v39 }
  0x15   :  { %322 = vmatpush3.bf16.msra.mxu0 %v319_v39 }
  0x16   :  { %324 = vmatprep.subr.bf16.mxu0 %v323_v44 }
  0x19   :  { %326 = vmatpush3.bf16.msra.mxu0 %v323_v44 }
  0x1a   :  { %328 = vmatprep.subr.bf16.mxu0 %v327_v47 }
  0x1d   :  { %330 = vmatpush3.bf16.msra.mxu0 %v327_v47 }
  0x1e   :  { %332 = vmatprep.subr.bf16.mxu0 %v331_v50 }
  0x21   :  { %334 = vmatpush3.bf16.msra.mxu0 %v331_v50 }
  0x24   :  { %301 = vmatmul.mubr.f32.vlgmr.msra.gmra.mrb[0].mxu0 %v83_v51 }
  0x97   :  { %v43_v52 = vpop.xlane.xlu0 %42 }
  0x98   :  { %v44_v53 = vrot.slane %v43_v52, 4  ;;  %v74_v2 = vpop.xlane.xlu1 %73 }
  0x99   :  { %v75_v15 = vrot.slane %v74_v2, 4 }
  0x9a   :  { %v45_v54 = vadd.f32 %v44_v53, %v43_v52 }
  0x9b   :  { %v30_v55 = vpop.xlane.xlu0 %29  ;;  %v76_v21 = vadd.f32 %v75_v15, %v74_v2 }
  0x9c   :  { %v46_v56 = vrot.slane %v45_v54, 2  ;;  %v31_v57 = vrot.slane %v30_v55, 4  ;;  %v61_v9 = vpop.xlane.xlu1 %60 }
  0x9d   :  { %v62_v13 = vrot.slane %v61_v9, 4  ;;  %v77_v24 = vrot.slane %v76_v21, 2 }
  0x9e   :  { %v32_v58 = vadd.f32 %v31_v57, %v30_v55  ;;  %v47_v59 = vadd.f32 %v46_v56, %v45_v54 }
  0x9f   :  { %v63_v20 = vadd.f32 %v62_v13, %v61_v9  ;;  %v78_v26 = vadd.f32 %v77_v24, %v76_v21 }
  0xa0   :  { %v33_v60 = vrot.slane %v32_v58, 2  ;;  %v48_v61 = vrot.slane %v47_v59, 1 }
  0xa1   :  { %v64_v23 = vrot.slane %v63_v20, 2  ;;  %v79_v28 = vrot.slane %v78_v26, 1 }
  0xa2   :  { %v34_v62 = vadd.f32 %v33_v60, %v32_v58  ;;  %v49_v0 = vadd.f32 %v48_v61, %v47_v59 }
  0xa3   :  { %v65_v25 = vadd.f32 %v64_v23, %v63_v20  ;;  %v80_v30 = vadd.f32 %v79_v28, %v78_v26 }
  0xa4   :  { %v35_v63 = vrot.slane %v34_v62, 1 }
  0xa5   :  { %v66_v27 = vrot.slane %v65_v25, 1 }
  0xa6   :  { %v36_v1 = vadd.f32 %v35_v63, %v34_v62 }
  0xa7   :  { %v67_v29 = vadd.f32 %v66_v27, %v65_v25 }
  0xa8   :  { %335 = vpush %v36_v1 }
  0xa9   :  { %337 = vpush %v49_v0 }
  0xaa   :  { %339 = vpush %v67_v29 }
  0xab   :  { %341 = vpush %v80_v30 }
  0xd9   :  { %s336_s4 = spop %335 }
  0xda   :  { %v222_v52 = vstv %s336_s4  ;;  %s338_s26 = spop %337 }
  0xdb   :  { %v223_v53 = vsel %vm221_vm2, %v222_v52, 0.0  ;;  %v225_v54 = vstv %s338_s26  ;;  %s340_s27 = spop %339 }
  0xdc   :  { %v226_v55 = vsel %vm224_vm3, %v225_v54, %v223_v53  ;;  %v228_v56 = vstv %s340_s27  ;;  %s342_s28 = spop %341 }
  0xdd   :  { %v229_v57 = vsel %vm227_vm4, %v228_v56, %v226_v55  ;;  %v231_v58 = vstv %s342_s28 }
  0xde   :  { %v232_v59 = vsel %vm230_vm5, %v231_v58, %v229_v57 }
  0xf7   :  { %v302_v5 = vpop.f32.mrb[0].mxu0 }
  0xf8   :  { %v179_v7 = vadd.f32 %v302_v5, %v247_v4  ;;  %v173_v8 = vpop.f32.mrb[1].mxu0 }
  0xf9   :  { %v174_v10 = vadd.f32 %v247_v4, %v173_v8 }
  0xfa   :  { %v249_v11 = vadd.f32 -1.0, %v179_v7 }
  0xfb   :  { %v248_v12 = vadd.f32 -1.0, %v174_v10  ;;  %v191_v22 = vmul.f32 %v174_v10, %v174_v10 }
  0xfc   :  { %v188_v14 = vmul.f32 %v249_v11, %v249_v11 }
  0xfd   :  { %v187_v16 = vmul.f32 %v248_v12, %v248_v12 }
  0xfe   :  { %v190_v17 = vsel %vm184_vm0, %v188_v14, 0.0 }
  0xff   :  { %v202_v18 = vsel %vm201_vm1, %v190_v17, 0.0  ;;  %v189_v19 = vsel %vm184_vm0, %v187_v16, 0.0 }
 0x100   :  { %203 = vadd.xlane.f32.xlu1 %v202_v18  ;;  %192 = vadd.xlane.f32.xlu0 %v189_v19 }
 0x104   :  { %212 = vadd.xlane.f32.xlu0 %v191_v22 }
 0x18d   :  { %v204_v31 = vpop.xlane.xlu1 %203  ;;  %v193_v32 = vpop.xlane.xlu0 %192 }
 0x18e   :  { %v205_v33 = vrot.slane %v204_v31, 4  ;;  %v194_v34 = vrot.slane %v193_v32, 4 }
 0x190   :  { %v206_v35 = vadd.f32 %v205_v33, %v204_v31  ;;  %v195_v36 = vadd.f32 %v194_v34, %v193_v32 }
 0x191   :  { %v213_v37 = vpop.xlane.xlu0 %212 }
 0x192   :  { %v207_v38 = vrot.slane %v206_v35, 2  ;;  %v196_v39 = vrot.slane %v195_v36, 2  ;;  %v214_v40 = vrot.slane %v213_v37, 4 }
 0x194   :  { %v208_v41 = vadd.f32 %v207_v38, %v206_v35  ;;  %v215_v42 = vadd.f32 %v214_v40, %v213_v37  ;;  %v197_v43 = vadd.f32 %v196_v39, %v195_v36 }
 0x196   :  { %v216_v44 = vrot.slane %v215_v42, 2  ;;  %v198_v45 = vrot.slane %v197_v43, 1  ;;  %v209_v46 = vrot.slane %v208_v41, 1 }
 0x198   :  { %v217_v47 = vadd.f32 %v216_v44, %v215_v42  ;;  %v199_v48 = vadd.f32 %v198_v45, %v197_v43  ;;  %v210_v49 = vadd.f32 %v209_v46, %v208_v41 }
 0x19a   :  { %343 = vpush %v199_v48  ;;  %v218_v50 = vrot.slane %v217_v47, 1 }
 0x19b   :  { %345 = vpush %v210_v49 }
 0x19c   :  { %v219_v51 = vadd.f32 %v218_v50, %v217_v47 }
 0x19e   :  { %347 = vpush %v219_v51 }
 0x1cb   :  { %s344_s29 = spop %343 }
 0x1cc   :  { %v234_v60 = vstv %s344_s29  ;;  %s346_s30 = spop %345 }
 0x1cd   :  { %v235_v61 = vsel %vm233_vm6, %v234_v60, %v232_v59  ;;  %v237_v62 = vstv %s346_s30 }
 0x1ce   :  { %v238_v63 = vsel %vm236_vm7, %v237_v62, %v235_v61 }
 0x1cf   :  { %s348_s6 = spop %347 }
 0x1d0   :  { %v240_v0 = vstv %s348_s6 }
 0x1d1   :  { %v241_v1 = vsel %vm239_vm8, %v240_v0, %v238_v63 }
 0x1d2   :  { %242 = vst [vmem:[%s490_s5] sm:$0x1] %v241_v1 }

</bundles_post_ra>
